<compile_context>
chip_gen: v6e
topology: v6e:2x2x1
jax: 0.10.0
libtpu: 0.0.40
codegen_flags: <defaults>
</compile_context>

<pallas_src>
import jax
import jax.numpy as jnp
import numpy as np
from jax.experimental import pallas as pl
from jax.experimental.pallas import tpu as pltpu  # noqa: F401  (TPU backend)

# ----------------------------- config (small) -------------------------------
B = 2            # num_complexes (batch of complexes)
NMAX = 16        # max number of 0-cells (nodes) per complex
EMAX = 16        # max number of 1-cells (edges) per complex
ATOM_TYPES = 5
BOND_TYPES = 4
ATOM_PAD = 8     # atom table rows padded to a sublane multiple
BOND_PAD = 8
HIDDEN = 32      # hidden == embed_dim
EMBED = HIDDEN
NUM_LAYERS = 2
OUT_SIZE = 3
FINAL_MULT = 2   # final_hidden_multiplier
MAX_DIM = 1

NROW_N = B * NMAX                 # folded node rows
NROW_E = B * EMAX                 # folded edge rows
NROW = NROW_N + NROW_E            # contiguous activation slab rows

FP = jnp.float32
BF = jnp.bfloat16


# ------------------------- fused forward kernel ------------------------------
def _fused_mpnn_kernel(ids_ref, up_ref, bnd_ref, mask_ref, smask_ref, emb_ref,
                       *rest):
    """Whole MPNN forward for the full batch in one invocation (grid=()).

    Activations live as a single (B*(NMAX+EMAX), H) f32 slab kept in VMEM/vregs:
    rows [0, B*NMAX) are node cells, rows [B*NMAX, NROW) are edge cells.
    """
    *prefs, out_ref = rest
    conv_refs = prefs[:2 * NUM_LAYERS]
    (wpx_ref, wpr_ref, bp_ref, w1_ref, b1_ref,
     w2n_ref, w2e_ref, b2_ref) = prefs[2 * NUM_LAYERS:]

    h = HIDDEN

    up_bd = up_ref[...]           # (NROW_N, NROW_N) bf16 block-diag node-node adjacency
    bnd_full = bnd_ref[...]       # (NROW, NROW_N) bf16: zeros ; block-diag edge-node
    bnd_bd = bnd_full[NROW_N:]    # (NROW_E, NROW_N) incidence used by the conv layers
    mask = mask_ref[...]          # (NROW, H) f32 pre-broadcast cell masks
    nmask = mask[:NROW_N]
    emask = mask[NROW_N:]

    # ---- init_conv (emb_method='embed'): single one-hot @ combined table ----
    ids = ids_ref[...]            # (NROW, 1) int32 (edge ids pre-offset by ATOM_PAD)
    onehot = (ids == jax.lax.broadcasted_iota(
        jnp.int32, (NROW, emb_ref.shape[0]), 1)).astype(FP)
    raw = jnp.dot(onehot, emb_ref[...], preferred_element_type=jnp.float32)  # (NROW, H)
    # InitReduceConv (sum): edge init += sum of boundary-node embeddings.
    # Node rows of bnd_full are all-zero, so the add is a no-op there.
    x = (raw + jnp.dot(bnd_full, raw[:NROW_N].astype(BF),
                       preferred_element_type=jnp.float32)) * mask
    ref0 = x                      # refs for the pool_weight gate

    # ---- message-passing layers (graph_norm=identity, layer_drop=identity) ----
    for l in range(NUM_LAYERS):
        w = conv_refs[2 * l][...]              # (Hin, 4H) bf16: [Wsn|Wnn|Wse|Wbe]
        b = conv_refs[2 * l + 1][...]          # (2, H) f32:  [b_node ; b_edge]
        p = jnp.dot(x.astype(BF), w, preferred_element_type=jnp.float32)  # (NROW,4H)
        p_n = p[:NROW_N]
        p_e = p[NROW_N:]
        n_msg = jnp.dot(up_bd, p_n[:, h:2 * h].astype(BF),
                        preferred_element_type=jnp.float32)
        e_msg = jnp.dot(bnd_bd, p_n[:, 3 * h:].astype(BF),
                        preferred_element_type=jnp.float32)
        hn = jnp.maximum(p_n[:, :h] + n_msg + b[0:1], 0.0) * nmask
        he = jnp.maximum(p_e[:, 2 * h:3 * h] + e_msg + b[1:2], 0.0) * emask
        x = jnp.concatenate([hn, he], axis=0)
    # jump_mode=None -> last layer outputs only.

    # ---- pool_weight gate + masked-sum readout (x_mask @ dense_x) ----
    gate = jax.nn.sigmoid(
        jnp.dot(x.astype(BF), wpx_ref[...], preferred_element_type=jnp.float32)
        + jnp.dot(ref0.astype(BF), wpr_ref[...], preferred_element_type=jnp.float32)
        + bp_ref[...])
    gated = gate * x
    # smask rows: [node mask of graph 0..B-1 ; edge mask of graph 0..B-1]
    pooled = jnp.dot(smask_ref[...], gated.astype(BF),
                     preferred_element_type=jnp.float32)     # (2B, H)

    # ---- per-dim lin1 + relu (packed [w1_nodes | w1_edges]) ----
    fh = FINAL_MULT * HIDDEN
    h1 = jnp.dot(pooled.astype(BF), w1_ref[...],
                 preferred_element_type=jnp.float32)          # (2B, 2*fh)
    hn1 = jnp.maximum(h1[:B, :fh] + b1_ref[0:1], 0.0)         # (B, fh) node branch
    he1 = jnp.maximum(h1[B:, fh:] + b1_ref[1:2], 0.0)         # (B, fh) edge branch

    # ---- lin2 (w2 split into node/edge halves: no lane-axis concatenate) ----
    out = (jnp.dot(hn1.astype(BF), w2n_ref[...], preferred_element_type=jnp.float32)
           + jnp.dot(he1.astype(BF), w2e_ref[...], preferred_element_type=jnp.float32)
           + b2_ref[...])
    out_ref[...] = out.astype(out_ref.dtype)


# ------------------------------ full forward ---------------------------------
@jax.jit
def mpnn_forward(node_types, edge_types, up_adj, bnd_adj, nmask, emask, packed):
    """Input preprocessing (batch folding / block-diag adjacency / mask slabs)
    in plain XLA, then one fused Pallas kernel for the whole network."""
    eye_b = jnp.eye(B, dtype=FP)

    # Block-diagonal adjacencies so per-batch aggregation is one folded matmul.
    up_bd = (eye_b[:, None, :, None] * up_adj[:, :, None, :]
             ).reshape(NROW_N, NROW_N).astype(BF)
    bnd_bd_f = (eye_b[:, None, :, None] * bnd_adj[:, :, None, :]
                ).reshape(NROW_E, NROW_N)
    # Zero-padded incidence: top NROW_N rows zero (node rows), bottom = bnd_bd.
    bnd_full = jnp.concatenate(
        [jnp.zeros((NROW_N, NROW_N), FP), bnd_bd_f], axis=0).astype(BF)

    # Pre-broadcast masks to a lane-dense (rows, H) slab (nodes then edges).
    nmask_bc = jnp.broadcast_to(nmask, (B, NMAX, HIDDEN)).reshape(NROW_N, HIDDEN)
    emask_bc = jnp.broadcast_to(emask, (B, EMAX, HIDDEN)).reshape(NROW_E, HIDDEN)
    mask_slab = jnp.concatenate([nmask_bc, emask_bc], axis=0)

    # Readout selector with mask values baked in: pooled = smask @ gated.
    nm = nmask[..., 0]                                    # (B, NMAX)
    em = emask[..., 0]                                    # (B, EMAX)
    s_n = (eye_b[:, :, None] * nm[None, :, :]).reshape(B, NROW_N)
    s_e = (eye_b[:, :, None] * em[None, :, :]).reshape(B, NROW_E)
    smask = jnp.concatenate([
        jnp.concatenate([s_n, jnp.zeros((B, NROW_E), FP)], axis=1),
        jnp.concatenate([jnp.zeros((B, NROW_N), FP), s_e], axis=1)],
        axis=0).astype(BF)                                # (2B, NROW)

    # Combined type ids: node ids, then edge ids offset past the padded atom table.
    ids = jnp.concatenate(
        [node_types.reshape(NROW_N).astype(jnp.int32),
         edge_types.reshape(NROW_E).astype(jnp.int32) + ATOM_PAD],
        axis=0).reshape(NROW, 1)

    conv_args = []
    for (w, b) in packed['convs']:
        conv_args += [w, b]

    args = (ids, up_bd, bnd_full, mask_slab, smask, packed['emb'],
            *conv_args, *packed['head'])

    return pl.pallas_call(
        _fused_mpnn_kernel,
        out_shape=jax.ShapeDtypeStruct((B, OUT_SIZE), FP),
    )(*args)


# ------------------------------ parameter init -------------------------------
def init_params(key):
    def nrm(k, shape, scale=0.1):
        return (scale * jax.random.normal(k, shape)).astype(FP)

    keys = jax.random.split(key, 64)
    ki = iter(keys)
    params = {
        'atom_emb': nrm(next(ki), (ATOM_TYPES, EMBED)),
        'bond_emb': nrm(next(ki), (BOND_TYPES, EMBED)),
        'convs': [],
    }
    for i in range(NUM_LAYERS):
        layer_dim = EMBED if i == 0 else HIDDEN
        params['convs'].append((
            nrm(next(ki), (layer_dim, HIDDEN)),     # W_self_node
            nrm(next(ki), (layer_dim, HIDDEN)),     # W_neighbor_node
            nrm(next(ki), (1, HIDDEN)),             # b_node
            nrm(next(ki), (layer_dim, HIDDEN)),     # W_self_edge
            nrm(next(ki), (layer_dim, HIDDEN)),     # W_boundary_edge
            nrm(next(ki), (1, HIDDEN)),             # b_edge
        ))
    params['head'] = (
        nrm(next(ki), (HIDDEN, HIDDEN)),                     # pool_weight: Wpx
        nrm(next(ki), (EMBED, HIDDEN)),                      # pool_weight: Wpr
        nrm(next(ki), (1, HIDDEN)),                          # pool_weight: bp
        nrm(next(ki), (HIDDEN, FINAL_MULT * HIDDEN)),        # lin1[0] (nodes)
        nrm(next(ki), (1, FINAL_MULT * HIDDEN)),
        nrm(next(ki), (HIDDEN, FINAL_MULT * HIDDEN)),        # lin1[1] (edges)
        nrm(next(ki), (1, FINAL_MULT * HIDDEN)),
        nrm(next(ki), (FINAL_MULT * HIDDEN * (MAX_DIM + 1), OUT_SIZE)),  # lin2
        nrm(next(ki), (1, OUT_SIZE)),
    )
    return params


def _pad_rows(a, rows):
    pad = rows - a.shape[0]
    if pad > 0:
        a = jnp.concatenate([a, jnp.zeros((pad, a.shape[1]), a.dtype)], axis=0)
    return a


def pack_params(params):
    """One-time host-side packing: combined embedding table, wide same-LHS weight
    matrices, bf16 MXU operands."""
    packed = {
        # Combined (ATOM_PAD + BOND_PAD, EMBED) f32 table: atoms then bonds.
        'emb': jnp.concatenate([_pad_rows(params['atom_emb'], ATOM_PAD),
                                _pad_rows(params['bond_emb'], BOND_PAD)], axis=0),
        'convs': [],
    }
    for (wns, wnn, bn, wes, wen, be) in params['convs']:
        w = jnp.concatenate([wns, wnn, wes, wen], axis=1).astype(BF)   # (Hin, 4H)
        b = jnp.concatenate([bn, be], axis=0)                          # (2, H) f32
        packed['convs'].append((w, b))
    (wpx, wpr, bp, w1n, b1n, w1e, b1e, w2, b2) = params['head']
    fh = FINAL_MULT * HIDDEN
    packed['head'] = (
        wpx.astype(BF), wpr.astype(BF), bp,
        jnp.concatenate([w1n, w1e], axis=1).astype(BF),   # (H, 2*fh)
        jnp.concatenate([b1n, b1e], axis=0),              # (2, fh) f32
        w2[:fh].astype(BF),                               # lin2 node half
        w2[fh:].astype(BF),                               # lin2 edge half
        b2,
    )
    return packed


# ------------------------------ example data ---------------------------------
def build_example_complexes():
    """Deterministic small complexes (ring graphs of different sizes).
    Plays the role of init_cells_to_dense_gcne's scatter-to-dense construction."""
    n_num = [NMAX, NMAX - 4]
    up_adj = np.zeros((B, NMAX, NMAX), np.float32)
    bnd_adj = np.zeros((B, EMAX, NMAX), np.float32)
    nmask = np.zeros((B, NMAX, 1), np.float32)
    emask = np.zeros((B, EMAX, 1), np.float32)
    node_types = np.zeros((B, NMAX), np.int32)
    edge_types = np.zeros((B, EMAX), np.int32)
    for b in range(B):
        nn = n_num[b]
        ne = nn  # ring graph: #edges == #nodes
        nmask[b, :nn, 0] = 1.0
        emask[b, :ne, 0] = 1.0
        node_types[b, :nn] = np.arange(nn) % ATOM_TYPES
        edge_types[b, :ne] = np.arange(ne) % BOND_TYPES
        for e in range(ne):
            i, j = e, (e + 1) % nn
            up_adj[b, i, j] = 1.0
            up_adj[b, j, i] = 1.0
            bnd_adj[b, e, i] = 1.0
            bnd_adj[b, e, j] = 1.0
    return (jnp.asarray(node_types), jnp.asarray(edge_types),
            jnp.asarray(up_adj), jnp.asarray(bnd_adj),
            jnp.asarray(nmask), jnp.asarray(emask))


if __name__ == "__main__":
    key = jax.random.PRNGKey(0)
    params = init_params(key)
    packed = pack_params(params)
    node_types, edge_types, up_adj, bnd_adj, nmask, emask = build_example_complexes()

    out = mpnn_forward(node_types, edge_types, up_adj, bnd_adj, nmask, emask, packed)
    out = jax.block_until_ready(out)
    assert out.shape == (B, OUT_SIZE), out.shape
    assert bool(jnp.all(jnp.isfinite(out)))
    print("KERNEL_OK")
</pallas_src>

<mosaic_0001>
module attributes {stable_mosaic.version = 11 : i64} {
  func.func @_fused_mpnn_kernel(%arg0: memref<64x1xi32, #tpu.memory_space<vmem>>, %arg1: memref<32x32xbf16, #tpu.memory_space<vmem>>, %arg2: memref<64x32xbf16, #tpu.memory_space<vmem>>, %arg3: memref<64x32xf32, #tpu.memory_space<vmem>>, %arg4: memref<4x64xbf16, #tpu.memory_space<vmem>>, %arg5: memref<16x32xf32, #tpu.memory_space<vmem>>, %arg6: memref<32x128xbf16, #tpu.memory_space<vmem>>, %arg7: memref<2x32xf32, #tpu.memory_space<vmem>>, %arg8: memref<32x128xbf16, #tpu.memory_space<vmem>>, %arg9: memref<2x32xf32, #tpu.memory_space<vmem>>, %arg10: memref<32x32xbf16, #tpu.memory_space<vmem>>, %arg11: memref<32x32xbf16, #tpu.memory_space<vmem>>, %arg12: memref<1x32xf32, #tpu.memory_space<vmem>>, %arg13: memref<32x128xbf16, #tpu.memory_space<vmem>>, %arg14: memref<2x64xf32, #tpu.memory_space<vmem>>, %arg15: memref<64x3xbf16, #tpu.memory_space<vmem>>, %arg16: memref<64x3xbf16, #tpu.memory_space<vmem>>, %arg17: memref<1x3xf32, #tpu.memory_space<vmem>>, %arg18: memref<2x3xf32, #tpu.memory_space<vmem>>) attributes {dimension_semantics = [], scalar_prefetch = 0 : i64, scratch_operands = 0 : i64, tpu.core_type = #tpu.core_type<tc>} {
    %c0 = arith.constant 0 : index
    %c0_0 = arith.constant 0 : index
    %0 = vector.load %arg1[%c0, %c0_0] : memref<32x32xbf16, #tpu.memory_space<vmem>>, vector<32x32xbf16>
    %c0_1 = arith.constant 0 : index
    %c0_2 = arith.constant 0 : index
    %1 = vector.load %arg2[%c0_1, %c0_2] : memref<64x32xbf16, #tpu.memory_space<vmem>>, vector<64x32xbf16>
    %2 = vector.extract_strided_slice %1 {offsets = [32, 0], sizes = [32, 32], strides = [1, 1]} : vector<64x32xbf16> to vector<32x32xbf16>
    %c0_3 = arith.constant 0 : index
    %c0_4 = arith.constant 0 : index
    %3 = vector.load %arg3[%c0_3, %c0_4] : memref<64x32xf32, #tpu.memory_space<vmem>>, vector<64x32xf32>
    %4 = vector.extract_strided_slice %3 {offsets = [0, 0], sizes = [32, 32], strides = [1, 1]} : vector<64x32xf32> to vector<32x32xf32>
    %5 = vector.extract_strided_slice %3 {offsets = [32, 0], sizes = [32, 32], strides = [1, 1]} : vector<64x32xf32> to vector<32x32xf32>
    %c0_5 = arith.constant 0 : index
    %c0_6 = arith.constant 0 : index
    %6 = vector.load %arg0[%c0_5, %c0_6] : memref<64x1xi32, #tpu.memory_space<vmem>>, vector<64x1xi32>
    %7 = tpu.iota {dimensions = array<i32: 1>} : vector<64x16xi32>
    %8 = vector.broadcast %6 : vector<64x1xi32> to vector<64x16xi32>
    %9 = arith.cmpi eq, %8, %7 : vector<64x16xi32>
    %10 = arith.extui %9 : vector<64x16xi1> to vector<64x16xi32>
    %11 = arith.sitofp %10 : vector<64x16xi32> to vector<64x16xf32>
    %c0_7 = arith.constant 0 : index
    %c0_8 = arith.constant 0 : index
    %12 = vector.load %arg5[%c0_7, %c0_8] : memref<16x32xf32, #tpu.memory_space<vmem>>, vector<16x32xf32>
    %cst = arith.constant dense<0.000000e+00> : vector<64x32xf32>
    %13 = tpu.matmul %11, %12, %cst {dimension_numbers = #tpu.dot_dimension_numbers<[1], [0], [0], [1], [0, 0, 1, 1], [], []>} : vector<64x16xf32>, vector<16x32xf32>, vector<64x32xf32> -> vector<64x32xf32>
    %14 = vector.extract_strided_slice %13 {offsets = [0, 0], sizes = [32, 32], strides = [1, 1]} : vector<64x32xf32> to vector<32x32xf32>
    %15 = arith.truncf %14 : vector<32x32xf32> to vector<32x32xbf16>
    %cst_9 = arith.constant dense<0.000000e+00> : vector<64x32xf32>
    %16 = tpu.matmul %1, %15, %cst_9 {dimension_numbers = #tpu.dot_dimension_numbers<[1], [0], [0], [1], [0, 0, 1, 1], [], []>} : vector<64x32xbf16>, vector<32x32xbf16>, vector<64x32xf32> -> vector<64x32xf32>
    %17 = arith.addf %13, %16 : vector<64x32xf32>
    %18 = arith.mulf %17, %3 : vector<64x32xf32>
    %c0_10 = arith.constant 0 : index
    %c0_11 = arith.constant 0 : index
    %19 = vector.load %arg6[%c0_10, %c0_11] : memref<32x128xbf16, #tpu.memory_space<vmem>>, vector<32x128xbf16>
    %c0_12 = arith.constant 0 : index
    %c0_13 = arith.constant 0 : index
    %20 = vector.load %arg7[%c0_12, %c0_13] : memref<2x32xf32, #tpu.memory_space<vmem>>, vector<2x32xf32>
    %21 = arith.truncf %18 : vector<64x32xf32> to vector<64x32xbf16>
    %cst_14 = arith.constant dense<0.000000e+00> : vector<64x128xf32>
    %22 = tpu.matmul %21, %19, %cst_14 {dimension_numbers = #tpu.dot_dimension_numbers<[1], [0], [0], [1], [0, 0, 1, 1], [], []>} : vector<64x32xbf16>, vector<32x128xbf16>, vector<64x128xf32> -> vector<64x128xf32>
    %23 = vector.extract_strided_slice %22 {offsets = [0, 0], sizes = [32, 128], strides = [1, 1]} : vector<64x128xf32> to vector<32x128xf32>
    %24 = vector.extract_strided_slice %22 {offsets = [32, 0], sizes = [32, 128], strides = [1, 1]} : vector<64x128xf32> to vector<32x128xf32>
    %25 = vector.extract_strided_slice %23 {offsets = [0, 32], sizes = [32, 32], strides = [1, 1]} : vector<32x128xf32> to vector<32x32xf32>
    %26 = arith.truncf %25 : vector<32x32xf32> to vector<32x32xbf16>
    %cst_15 = arith.constant dense<0.000000e+00> : vector<32x32xf32>
    %27 = tpu.matmul %0, %26, %cst_15 {dimension_numbers = #tpu.dot_dimension_numbers<[1], [0], [0], [1], [0, 0, 1, 1], [], []>} : vector<32x32xbf16>, vector<32x32xbf16>, vector<32x32xf32> -> vector<32x32xf32>
    %28 = vector.extract_strided_slice %23 {offsets = [0, 96], sizes = [32, 32], strides = [1, 1]} : vector<32x128xf32> to vector<32x32xf32>
    %29 = arith.truncf %28 : vector<32x32xf32> to vector<32x32xbf16>
    %cst_16 = arith.constant dense<0.000000e+00> : vector<32x32xf32>
    %30 = tpu.matmul %2, %29, %cst_16 {dimension_numbers = #tpu.dot_dimension_numbers<[1], [0], [0], [1], [0, 0, 1, 1], [], []>} : vector<32x32xbf16>, vector<32x32xbf16>, vector<32x32xf32> -> vector<32x32xf32>
    %31 = vector.extract_strided_slice %23 {offsets = [0, 0], sizes = [32, 32], strides = [1, 1]} : vector<32x128xf32> to vector<32x32xf32>
    %32 = arith.addf %31, %27 : vector<32x32xf32>
    %33 = vector.extract_strided_slice %20 {offsets = [0, 0], sizes = [1, 32], strides = [1, 1]} : vector<2x32xf32> to vector<1x32xf32>
    %34 = vector.broadcast %33 : vector<1x32xf32> to vector<32x32xf32>
    %35 = arith.addf %32, %34 : vector<32x32xf32>
    %cst_17 = arith.constant 0.000000e+00 : f32
    %36 = vector.broadcast %cst_17 : f32 to vector<32x32xf32>
    %37 = arith.maximumf %35, %36 : vector<32x32xf32>
    %38 = arith.mulf %37, %4 : vector<32x32xf32>
    %39 = vector.extract_strided_slice %24 {offsets = [0, 64], sizes = [32, 32], strides = [1, 1]} : vector<32x128xf32> to vector<32x32xf32>
    %40 = arith.addf %39, %30 : vector<32x32xf32>
    %41 = vector.extract_strided_slice %20 {offsets = [1, 0], sizes = [1, 32], strides = [1, 1]} : vector<2x32xf32> to vector<1x32xf32>
    %42 = vector.broadcast %41 : vector<1x32xf32> to vector<32x32xf32>
    %43 = arith.addf %40, %42 : vector<32x32xf32>
    %cst_18 = arith.constant 0.000000e+00 : f32
    %44 = vector.broadcast %cst_18 : f32 to vector<32x32xf32>
    %45 = arith.maximumf %43, %44 : vector<32x32xf32>
    %46 = arith.mulf %45, %5 : vector<32x32xf32>
    %47 = tpu.concatenate %38, %46 in 0 : vector<32x32xf32>, vector<32x32xf32> -> vector<64x32xf32>
    %c0_19 = arith.constant 0 : index
    %c0_20 = arith.constant 0 : index
    %48 = vector.load %arg8[%c0_19, %c0_20] : memref<32x128xbf16, #tpu.memory_space<vmem>>, vector<32x128xbf16>
    %c0_21 = arith.constant 0 : index
    %c0_22 = arith.constant 0 : index
    %49 = vector.load %arg9[%c0_21, %c0_22] : memref<2x32xf32, #tpu.memory_space<vmem>>, vector<2x32xf32>
    %50 = arith.truncf %47 : vector<64x32xf32> to vector<64x32xbf16>
    %cst_23 = arith.constant dense<0.000000e+00> : vector<64x128xf32>
    %51 = tpu.matmul %50, %48, %cst_23 {dimension_numbers = #tpu.dot_dimension_numbers<[1], [0], [0], [1], [0, 0, 1, 1], [], []>} : vector<64x32xbf16>, vector<32x128xbf16>, vector<64x128xf32> -> vector<64x128xf32>
    %52 = vector.extract_strided_slice %51 {offsets = [0, 0], sizes = [32, 128], strides = [1, 1]} : vector<64x128xf32> to vector<32x128xf32>
    %53 = vector.extract_strided_slice %51 {offsets = [32, 0], sizes = [32, 128], strides = [1, 1]} : vector<64x128xf32> to vector<32x128xf32>
    %54 = vector.extract_strided_slice %52 {offsets = [0, 32], sizes = [32, 32], strides = [1, 1]} : vector<32x128xf32> to vector<32x32xf32>
    %55 = arith.truncf %54 : vector<32x32xf32> to vector<32x32xbf16>
    %cst_24 = arith.constant dense<0.000000e+00> : vector<32x32xf32>
    %56 = tpu.matmul %0, %55, %cst_24 {dimension_numbers = #tpu.dot_dimension_numbers<[1], [0], [0], [1], [0, 0, 1, 1], [], []>} : vector<32x32xbf16>, vector<32x32xbf16>, vector<32x32xf32> -> vector<32x32xf32>
    %57 = vector.extract_strided_slice %52 {offsets = [0, 96], sizes = [32, 32], strides = [1, 1]} : vector<32x128xf32> to vector<32x32xf32>
    %58 = arith.truncf %57 : vector<32x32xf32> to vector<32x32xbf16>
    %cst_25 = arith.constant dense<0.000000e+00> : vector<32x32xf32>
    %59 = tpu.matmul %2, %58, %cst_25 {dimension_numbers = #tpu.dot_dimension_numbers<[1], [0], [0], [1], [0, 0, 1, 1], [], []>} : vector<32x32xbf16>, vector<32x32xbf16>, vector<32x32xf32> -> vector<32x32xf32>
    %60 = vector.extract_strided_slice %52 {offsets = [0, 0], sizes = [32, 32], strides = [1, 1]} : vector<32x128xf32> to vector<32x32xf32>
    %61 = arith.addf %60, %56 : vector<32x32xf32>
    %62 = vector.extract_strided_slice %49 {offsets = [0, 0], sizes = [1, 32], strides = [1, 1]} : vector<2x32xf32> to vector<1x32xf32>
    %63 = vector.broadcast %62 : vector<1x32xf32> to vector<32x32xf32>
    %64 = arith.addf %61, %63 : vector<32x32xf32>
    %cst_26 = arith.constant 0.000000e+00 : f32
    %65 = vector.broadcast %cst_26 : f32 to vector<32x32xf32>
    %66 = arith.maximumf %64, %65 : vector<32x32xf32>
    %67 = arith.mulf %66, %4 : vector<32x32xf32>
    %68 = vector.extract_strided_slice %53 {offsets = [0, 64], sizes = [32, 32], strides = [1, 1]} : vector<32x128xf32> to vector<32x32xf32>
    %69 = arith.addf %68, %59 : vector<32x32xf32>
    %70 = vector.extract_strided_slice %49 {offsets = [1, 0], sizes = [1, 32], strides = [1, 1]} : vector<2x32xf32> to vector<1x32xf32>
    %71 = vector.broadcast %70 : vector<1x32xf32> to vector<32x32xf32>
    %72 = arith.addf %69, %71 : vector<32x32xf32>
    %cst_27 = arith.constant 0.000000e+00 : f32
    %73 = vector.broadcast %cst_27 : f32 to vector<32x32xf32>
    %74 = arith.maximumf %72, %73 : vector<32x32xf32>
    %75 = arith.mulf %74, %5 : vector<32x32xf32>
    %76 = tpu.concatenate %67, %75 in 0 : vector<32x32xf32>, vector<32x32xf32> -> vector<64x32xf32>
    %77 = arith.truncf %76 : vector<64x32xf32> to vector<64x32xbf16>
    %c0_28 = arith.constant 0 : index
    %c0_29 = arith.constant 0 : index
    %78 = vector.load %arg10[%c0_28, %c0_29] : memref<32x32xbf16, #tpu.memory_space<vmem>>, vector<32x32xbf16>
    %cst_30 = arith.constant dense<0.000000e+00> : vector<64x32xf32>
    %79 = tpu.matmul %77, %78, %cst_30 {dimension_numbers = #tpu.dot_dimension_numbers<[1], [0], [0], [1], [0, 0, 1, 1], [], []>} : vector<64x32xbf16>, vector<32x32xbf16>, vector<64x32xf32> -> vector<64x32xf32>
    %80 = arith.truncf %18 : vector<64x32xf32> to vector<64x32xbf16>
    %c0_31 = arith.constant 0 : index
    %c0_32 = arith.constant 0 : index
    %81 = vector.load %arg11[%c0_31, %c0_32] : memref<32x32xbf16, #tpu.memory_space<vmem>>, vector<32x32xbf16>
    %cst_33 = arith.constant dense<0.000000e+00> : vector<64x32xf32>
    %82 = tpu.matmul %80, %81, %cst_33 {dimension_numbers = #tpu.dot_dimension_numbers<[1], [0], [0], [1], [0, 0, 1, 1], [], []>} : vector<64x32xbf16>, vector<32x32xbf16>, vector<64x32xf32> -> vector<64x32xf32>
    %83 = arith.addf %79, %82 : vector<64x32xf32>
    %c0_34 = arith.constant 0 : index
    %c0_35 = arith.constant 0 : index
    %84 = vector.load %arg12[%c0_34, %c0_35] : memref<1x32xf32, #tpu.memory_space<vmem>>, vector<1x32xf32>
    %85 = vector.broadcast %84 : vector<1x32xf32> to vector<64x32xf32>
    %86 = arith.addf %83, %85 : vector<64x32xf32>
    %87 = arith.negf %86 : vector<64x32xf32>
    %88 = math.exp %87 : vector<64x32xf32>
    %cst_36 = arith.constant 1.000000e+00 : f32
    %89 = vector.broadcast %cst_36 : f32 to vector<64x32xf32>
    %90 = arith.addf %89, %88 : vector<64x32xf32>
    %91 = arith.divf %89, %90 : vector<64x32xf32>
    %92 = arith.mulf %91, %76 : vector<64x32xf32>
    %c0_37 = arith.constant 0 : index
    %c0_38 = arith.constant 0 : index
    %93 = vector.load %arg4[%c0_37, %c0_38] : memref<4x64xbf16, #tpu.memory_space<vmem>>, vector<4x64xbf16>
    %94 = arith.truncf %92 : vector<64x32xf32> to vector<64x32xbf16>
    %cst_39 = arith.constant dense<0.000000e+00> : vector<4x32xf32>
    %95 = tpu.matmul %93, %94, %cst_39 {dimension_numbers = #tpu.dot_dimension_numbers<[1], [0], [0], [1], [0, 0, 1, 1], [], []>} : vector<4x64xbf16>, vector<64x32xbf16>, vector<4x32xf32> -> vector<4x32xf32>
    %96 = arith.truncf %95 : vector<4x32xf32> to vector<4x32xbf16>
    %c0_40 = arith.constant 0 : index
    %c0_41 = arith.constant 0 : index
    %97 = vector.load %arg13[%c0_40, %c0_41] : memref<32x128xbf16, #tpu.memory_space<vmem>>, vector<32x128xbf16>
    %cst_42 = arith.constant dense<0.000000e+00> : vector<4x128xf32>
    %98 = tpu.matmul %96, %97, %cst_42 {dimension_numbers = #tpu.dot_dimension_numbers<[1], [0], [0], [1], [0, 0, 1, 1], [], []>} : vector<4x32xbf16>, vector<32x128xbf16>, vector<4x128xf32> -> vector<4x128xf32>
    %99 = vector.extract_strided_slice %98 {offsets = [0, 0], sizes = [2, 64], strides = [1, 1]} : vector<4x128xf32> to vector<2x64xf32>
    %c0_43 = arith.constant 0 : index
    %c0_44 = arith.constant 0 : index
    %100 = vector.load %arg14[%c0_43, %c0_44] : memref<2x64xf32, #tpu.memory_space<vmem>>, vector<1x64xf32>
    %101 = vector.broadcast %100 : vector<1x64xf32> to vector<2x64xf32>
    %102 = arith.addf %99, %101 : vector<2x64xf32>
    %cst_45 = arith.constant 0.000000e+00 : f32
    %103 = vector.broadcast %cst_45 : f32 to vector<2x64xf32>
    %104 = arith.maximumf %102, %103 : vector<2x64xf32>
    %105 = vector.extract_strided_slice %98 {offsets = [2, 64], sizes = [2, 64], strides = [1, 1]} : vector<4x128xf32> to vector<2x64xf32>
    %c1 = arith.constant 1 : index
    %c0_46 = arith.constant 0 : index
    %106 = vector.load %arg14[%c1, %c0_46] : memref<2x64xf32, #tpu.memory_space<vmem>>, vector<1x64xf32>
    %107 = vector.broadcast %106 : vector<1x64xf32> to vector<2x64xf32>
    %108 = arith.addf %105, %107 : vector<2x64xf32>
    %cst_47 = arith.constant 0.000000e+00 : f32
    %109 = vector.broadcast %cst_47 : f32 to vector<2x64xf32>
    %110 = arith.maximumf %108, %109 : vector<2x64xf32>
    %111 = arith.truncf %104 : vector<2x64xf32> to vector<2x64xbf16>
    %c0_48 = arith.constant 0 : index
    %c0_49 = arith.constant 0 : index
    %112 = vector.load %arg15[%c0_48, %c0_49] : memref<64x3xbf16, #tpu.memory_space<vmem>>, vector<64x3xbf16>
    %cst_50 = arith.constant dense<0.000000e+00> : vector<2x3xf32>
    %113 = tpu.matmul %111, %112, %cst_50 {dimension_numbers = #tpu.dot_dimension_numbers<[1], [0], [0], [1], [0, 0, 1, 1], [], []>} : vector<2x64xbf16>, vector<64x3xbf16>, vector<2x3xf32> -> vector<2x3xf32>
    %114 = arith.truncf %110 : vector<2x64xf32> to vector<2x64xbf16>
    %c0_51 = arith.constant 0 : index
    %c0_52 = arith.constant 0 : index
    %115 = vector.load %arg16[%c0_51, %c0_52] : memref<64x3xbf16, #tpu.memory_space<vmem>>, vector<64x3xbf16>
    %cst_53 = arith.constant dense<0.000000e+00> : vector<2x3xf32>
    %116 = tpu.matmul %114, %115, %cst_53 {dimension_numbers = #tpu.dot_dimension_numbers<[1], [0], [0], [1], [0, 0, 1, 1], [], []>} : vector<2x64xbf16>, vector<64x3xbf16>, vector<2x3xf32> -> vector<2x3xf32>
    %117 = arith.addf %113, %116 : vector<2x3xf32>
    %c0_54 = arith.constant 0 : index
    %c0_55 = arith.constant 0 : index
    %118 = vector.load %arg17[%c0_54, %c0_55] : memref<1x3xf32, #tpu.memory_space<vmem>>, vector<1x3xf32>
    %119 = vector.broadcast %118 : vector<1x3xf32> to vector<2x3xf32>
    %120 = arith.addf %117, %119 : vector<2x3xf32>
    %c0_56 = arith.constant 0 : index
    %c0_57 = arith.constant 0 : index
    %121 = vector.load %arg18[%c0_56, %c0_57] : memref<2x3xf32, #tpu.memory_space<vmem>>, vector<2x3xf32>
    tpu.vector_store %arg18[%c0_56, %c0_57], %120 {strides = array<i32>} : memref<2x3xf32, #tpu.memory_space<vmem>>, vector<2x3xf32>,
    return
  }
}

</mosaic_0001>

<bundles_post_ra>
// kernel: mpnn_forward.1
= control target key start
LH: loop header
LB: loop body
LE: loop exit
PB: predicated region body
PF: predicated region fallthrough
CT: control target
= control target key end

     0   :  { %s2454_s0 = inlined_call_operand.vmem [shape: s32[64,1], index: 0, kind: input, shape index: {}]   ;;  %s2455_s1 = inlined_call_operand.vmem [shape: bf16[32,32], index: 1, kind: input, shape index: {}]   ;;  %s2456_s2 = inlined_call_operand.vmem [shape: bf16[64,32], index: 2, kind: input, shape index: {}]   ;;  %s2457_s3 = inlined_call_operand.vmem [shape: f32[64,32], index: 3, kind: input, shape index: {}]   ;;  %s2458_s4 = inlined_call_operand.vmem [shape: bf16[4,64], index: 4, kind: input, shape index: {}]   ;;  %s2459_s5 = inlined_call_operand.vmem [shape: f32[16,32], index: 5, kind: input, shape index: {}]   ;;  %s2460_s6 = inlined_call_operand.vmem [shape: bf16[32,128], index: 6, kind: input, shape index: {}]   ;;  %s2461_s7 = inlined_call_operand.vmem [shape: f32[2,32], index: 7, kind: input, shape index: {}]   ;;  %s2462_s8 = inlined_call_operand.vmem [shape: bf16[32,128], index: 8, kind: input, shape index: {}]   ;;  %s2463_s9 = inlined_call_operand.vmem [shape: f32[2,32], index: 9, kind: input, shape index: {}]   ;;  %s2464_s10 = inlined_call_operand.vmem [shape: bf16[32,32], index: 10, kind: input, shape index: {}]   ;;  %s2465_s11 = inlined_call_operand.vmem [shape: bf16[32,32], index: 11, kind: input, shape index: {}]   ;;  %s2466_s12 = inlined_call_operand.vmem [shape: f32[1,32], index: 12, kind: input, shape index: {}]   ;;  %s2467_s13 = inlined_call_operand.vmem [shape: bf16[32,128], index: 13, kind: input, shape index: {}]   ;;  %s2468_s14 = inlined_call_operand.vmem [shape: f32[2,64], index: 14, kind: input, shape index: {}]   ;;  %s2469_s15 = inlined_call_operand.vmem [shape: bf16[64,3], index: 15, kind: input, shape index: {}]   ;;  %s2470_s16 = inlined_call_operand.vmem [shape: bf16[64,3], index: 16, kind: input, shape index: {}]   ;;  %s2471_s17 = inlined_call_operand.vmem [shape: f32[1,3], index: 17, kind: input, shape index: {}]   ;;  %s2472_s18 = inlined_call_operand.hbm [shape: f32[2,3], index: 18, kind: output, shape index: {}]  }
   0x1   :  { %2476 = sst [smem:[#allocation5_spill]] %s2454_s0 }
   0x2   :  { %2477 = sst [smem:[#allocation6_spill]] %s2455_s1 }
   0x3   :  { %2478 = sst [smem:[#allocation7_spill]] %s2456_s2 }
   0x4   :  { %s2479_s29 = sld [smem:[#allocation5_spill]]  ;;  %v1958_v2 = vmov 0   ;;  %v140_v5 = vld [vmem:[%s2459_s5 + $0x8] sm:$0xff]  ;;  %v139_v6 = vld [vmem:[%s2459_s5] sm:$0xff] }
   0x5   :  { %1869 = vset.pattern.permute.xlu1 %v1958_v2  ;;  %1868 = vset.pattern.permute.xlu0 %v1958_v2 }
   0x6   :  { %1709 = vmatprep.subr.mxu0 %v140_v5 }
   0x7   :  { %1710 = vmatpush3.msra.mxu0 %v140_v5 }
   0x8   :  { %1711 = vmatprep.subr.mxu0 %v139_v6 }
   0x9   :  { %1712 = vmatpush3.msra.mxu0 %v139_v6 }
   0xa   :  { %v83_v0 = vld [vmem:[%s2479_s29 + $0x10] sm:$0xff]  ;;  %v81_v1 = vld [vmem:[%s2479_s29] sm:$0xff]  ;;  %v84_v3 = vld [vmem:[%s2479_s29 + $0x18] sm:$0xff] }
   0xb   :  { %98 = vperm.xlu1 %1869, %v83_v0   ;;  %92 = vperm.xlu0 %1868, %v81_v1   ;;  %v82_v4 = vld [vmem:[%s2479_s29 + $0x8] sm:$0xff]  ;;  %v85_v8 = vld [vmem:[%s2479_s29 + $0x20] sm:$0xff]  ;;  %v88_v9 = vld [vmem:[%s2479_s29 + $0x38] sm:$0xff] }
   0xc   :  { %v86_v7 = vld [vmem:[%s2479_s29 + $0x28] sm:$0xff]  ;;  %v87_v10 = vld [vmem:[%s2479_s29 + $0x30] sm:$0xff] }
   0xf   :  { %101 = vperm.xlu1 %1869, %v84_v3   ;;  %95 = vperm.xlu0 %1868, %v82_v4  }
  0x13   :  { %107 = vperm.xlu1 %1869, %v86_v7   ;;  %104 = vperm.xlu0 %1868, %v85_v8  }
  0x17   :  { %113 = vperm.xlu1 %1869, %v88_v9   ;;  %110 = vperm.xlu0 %1868, %v87_v10  }
  0x18   :  { %23 = vsyncpa [#allocation3], 0  ;;  %v89_v11 = vlaneseq  ;;  %vm141_vm0 = vcmask 130048   ;;  %v1959_v15 = vmov 0.0   ;;  %s2480_s20 = sld [smem:[#allocation7_spill]]  ;;  %vm293_vm9 = vcmask 261120  }
  0x19   :  { %v1884_v40 = vld [vmem:[%s2460_s6 + $0x8] sm:$0xff]   ;;  %v1885_v41 = vld [vmem:[%s2460_s6] sm:$0xff]   ;;  %v2138_v48 = vld [vmem:[%s2457_s3 + $0x18] sm:$0xff]  ;;  %s2481_s0 = sld [smem:[#allocation6_spill]]  ;;  %s1960_s19 = smov 96   ;;  %vm1963_vm10 = vmmov 0  }
  0x1a   :  { %v90_v12 = vand.u32 127, %v89_v11  ;;  %1737 = vmatprep.subr.bf16.mxu0 %v1884_v40  ;;  %v2143_v51 = vld [vmem:[%s2457_s3] sm:$0xff]  ;;  %v2148_v52 = vld [vmem:[%s2457_s3 + $0x8] sm:$0xff]  ;;  %v2153_v54 = vld [vmem:[%s2457_s3 + $0x10] sm:$0xff]  ;;  %s1961_s1 = smov 32   ;;  %s1962_s21 = smov 64  }
  0x1b   :  { %v2166_v4 = vld [vmem:[%s2457_s3 + $0x38] sm:$0xff]  ;;  %v2173_v7 = vld [vmem:[%s2457_s3 + $0x20] sm:$0xff]  ;;  %v2178_v8 = vld [vmem:[%s2457_s3 + $0x28] sm:$0xff]  ;;  %vm1249_vm11 = vcmask 523264   ;;  %vm1535_vm12 = vcmask 17408  }
  0x1c   :  { %v2185_v10 = vld [vmem:[%s2457_s3 + $0x30] sm:$0xff] }
  0x1e   :  { %v1880_v30 = vld [vmem:[%s2480_s20] sm:$0xff]   ;;  %v1881_v37 = vld [vmem:[%s2480_s20 + $0x8] sm:$0xff]   ;;  %v2117_v38 = vld [vmem:[%s2480_s20 + $0x10] sm:$0xff]  }
  0x1f   :  { %1729 = vmatprep.mubr.msk.bf16.mxu1 %vm293_vm9, %v1880_v30  ;;  %v2125_v39 = vld [vmem:[%s2480_s20 + $0x18] sm:$0xff]  }
  0x86   :  { %v99_v13 = vpop.permute.xlu1 %98  ;;  %v93_v14 = vpop.permute.xlu0 %92 }
  0x87   :  { %vm115_vm1 = vcmp.eq.s32.totalorder %v93_v14, %v90_v12  ;;  %vm117_vm2 = vcmp.eq.s32.totalorder %v99_v13, %v90_v12 }
  0x88   :  { %v1551_v16 = vsel %vm115_vm1, 1.0, %v1959_v15  ;;  %v1553_v19 = vsel %vm117_vm2, 1.0, %v1959_v15 }
  0x89   :  { %1713 = vmatprep.mubr.msk.f32.mxu0 %vm141_vm0, %v1551_v16 }
  0x8a   :  { %v102_v17 = vpop.permute.xlu1 %101  ;;  %v96_v18 = vpop.permute.xlu0 %95 }
  0x8b   :  { %vm116_vm3 = vcmp.eq.s32.totalorder %v96_v18, %v90_v12  ;;  %vm118_vm4 = vcmp.eq.s32.totalorder %v102_v17, %v90_v12 }
  0x8c   :  { %v1552_v20 = vsel %vm116_vm3, 1.0, %v1959_v15  ;;  %v1554_v23 = vsel %vm118_vm4, 1.0, %v1959_v15 }
  0x8d   :  { %1714 = vmatmul.mubr.msk.f32.vlgmr.msra.gmra.mxu0 %vm141_vm0, %v1552_v20  ;;  %v1886_v20 = vld [vmem:[%s2481_s0] sm:$0xff]  }
  0x8e   :  { %v108_v21 = vpop.permute.xlu1 %107  ;;  %1716 = vmatprep.mubr.msk.f32.mxu0 %vm141_vm0, %v1553_v19  ;;  %v105_v22 = vpop.permute.xlu0 %104  ;;  %1738 = vmatpush3.bf16.msra.mxu0 %v1884_v40 }
  0x8f   :  { %vm119_vm5 = vcmp.eq.s32.totalorder %v105_v22, %v90_v12  ;;  %vm120_vm6 = vcmp.eq.s32.totalorder %v108_v21, %v90_v12  ;;  %1739 = vmatprep.subr.bf16.mxu0 %v1885_v41 }
  0x90   :  { %v1555_v24 = vsel %vm119_vm5, 1.0, %v1959_v15  ;;  %v1556_v27 = vsel %vm120_vm6, 1.0, %v1959_v15 }
  0x91   :  { %1717 = vmatmul.mubr.msk.f32.gmra.mxu0 %vm141_vm0, %v1554_v23 }
  0x92   :  { %v114_v25 = vpop.permute.xlu1 %113  ;;  %1719 = vmatprep.mubr.msk.f32.mxu0 %vm141_vm0, %v1555_v24  ;;  %v111_v26 = vpop.permute.xlu0 %110  ;;  %1740 = vmatpush3.bf16.msra.mxu0 %v1885_v41 }
  0x93   :  { %vm121_vm7 = vcmp.eq.s32.totalorder %v111_v26, %v90_v12  ;;  %vm122_vm8 = vcmp.eq.s32.totalorder %v114_v25, %v90_v12 }
  0x94   :  { %v1557_v28 = vsel %vm121_vm7, 1.0, %v1959_v15  ;;  %v1558_v29 = vsel %vm122_vm8, 1.0, %v1959_v15 }
  0x95   :  { %1720 = vmatmul.mubr.msk.f32.gmra.mxu0 %vm141_vm0, %v1556_v27 }
  0x96   :  { %1722 = vmatprep.mubr.msk.f32.mxu0 %vm141_vm0, %v1557_v28 }
  0x99   :  { %1723 = vmatmul.mubr.msk.f32.gmra.mxu0 %vm141_vm0, %v1558_v29  ;;  %v2210_v29 = vld [vmem:[%s2481_s0 + $0x8] sm:$0xff]  }
 0x14d   :  { %v1715_v31 = vpop.f32.mrf.mxu0 }
 0x14f   :  { %v232_v32 = vpop.f32.mrf.mxu0 }
 0x150   :  { %v271_v36 = vpack.c.bf16 %v1715_v31, %v232_v32 }
 0x151   :  { %v1718_v33 = vpop.f32.mrf.mxu0 }
 0x153   :  { %v242_v34 = vpop.f32.mrf.mxu0 }
 0x154   :  { %v272_v35 = vpack.c.bf16 %v1718_v33, %v242_v34 }
 0x155   :  { %v1721_v43 = vpop.f32.mrf.mxu0 }
 0x156   :  { %1725 = vmatprep.subr.bf16.mxu1 %v272_v35 }
 0x157   :  { %1726 = vmatpush3.bf16.msra.mxu1 %v272_v35  ;;  %v252_v46 = vpop.f32.mrf.mxu0 }
 0x158   :  { %1727 = vmatprep.subr.bf16.mxu1 %v271_v36 }
 0x159   :  { %v1724_v58 = vpop.f32.mrf.mxu0 }
 0x15b   :  { %1728 = vmatpush3.bf16.msra.mxu1 %v271_v36  ;;  %v262_v2 = vpop.f32.mrf.mxu0  ;;  %v1888_v36 = vld [vmem:[%s2462_s8 + $0x8] sm:$0xff]  }
 0x15c   :  { %1765 = vmatprep.subr.bf16.mxu0 %v1888_v36 }
 0x15e   :  { %1730 = vmatmul.mubr.msk.bf16.vlgmr.msra.gmra.mxu1 %vm293_vm9, %v1881_v37 }
 0x15f   :  { %1733 = vmatprep.mubr.msk.bf16.mxu1 %vm293_vm9, %v2117_v38 }
 0x166   :  { %1734 = vmatmul.mubr.msk.bf16.gmra.mxu1 %vm293_vm9, %v2125_v39 }
 0x167   :  { %1753 = vmatprep.mubr.msk.bf16.mxu1 %vm293_vm9, %v1886_v20 }
 0x21e   :  { %v1731_v42 = vpop.f32.mrf.mxu1 }
 0x21f   :  { %v373_v50 = vadd.f32 %v1731_v42, %v242_v34  ;;  %v391_v34 = vld [vmem:[%s2461_s7] sm:$0x3] }
 0x220   :  { %v340_v44 = vpop.f32.mrf.mxu1 }
 0x221   :  { %v371_v47 = vadd.f32 %v340_v44, %v232_v32  ;;  %v381_v61 = vmul.f32 %v373_v50, %v2153_v54  ;;  %v2220_v32 = vshrl.u32 %v89_v11, 7  ;;  %v1889_v11 = vld [vmem:[%s2462_s8] sm:$0xff]  }
 0x222   :  { %v1732_v45 = vpop.f32.mrf.mxu1 }
 0x223   :  { %v374_v49 = vadd.f32 %v1732_v45, %v1718_v33  ;;  %v379_v59 = vmul.f32 %v371_v47, %v2143_v51  ;;  %v657_v33 = vsub.s32 1, %v2220_v32  ;;  %v621_v37 = vsub.s32 0, %v2220_v32 }
 0x224   :  { %v343_v53 = vpop.f32.mrf.mxu1 }
 0x225   :  { %v372_v55 = vadd.f32 %v1715_v31, %v343_v53  ;;  %v382_v56 = vmul.f32 %v374_v49, %v2138_v48  ;;  %v658_v35 = vrot.slane %v391_v34, %v657_v33  ;;  %v622_v42 = vrot.slane %v391_v34, %v621_v37 }
 0x226   :  { %v1735_v57 = vpop.f32.mrf.mxu1 }
 0x227   :  { %v380_v60 = vmul.f32 %v372_v55, %v2148_v52  ;;  %v2161_v0 = vpack.c.bf16 %v382_v56, %v381_v61  ;;  %v377_v6 = vadd.f32 %v1735_v57, %v262_v2 }
 0x228   :  { %v356_v62 = vpop.f32.mrf.mxu1 }
 0x229   :  { %v2159_v63 = vpack.c.bf16 %v380_v60, %v379_v59  ;;  %v375_v3 = vadd.f32 %v356_v62, %v252_v46  ;;  %v385_v17 = vmul.f32 %v377_v6, %v2185_v10 }
 0x22a   :  { %v1736_v1 = vpop.f32.mrf.mxu1 }
 0x22b   :  { %v378_v5 = vadd.f32 %v1736_v1, %v1724_v58  ;;  %1741 = vmatprep.mubr.msk.bf16.mxu0 %vm293_vm9, %v2159_v63  ;;  %v383_v14 = vmul.f32 %v375_v3, %v2173_v7 }
 0x22c   :  { %v359_v9 = vpop.f32.mrf.mxu1  ;;  %1742 = vmatmul.mubr.msk.bf16.vlgmr.msra.gmra.mxu0 %vm293_vm9, %v2161_v0 }
 0x22d   :  { %v376_v12 = vadd.f32 %v1721_v43, %v359_v9  ;;  %v386_v13 = vmul.f32 %v378_v5, %v2166_v4  ;;  %1766 = vmatpush3.bf16.msra.mxu0 %v1888_v36 }
 0x22e   :  { %1767 = vmatprep.subr.bf16.mxu0 %v1889_v11 }
 0x22f   :  { %v384_v16 = vmul.f32 %v376_v12, %v2178_v8  ;;  %v2193_v19 = vpack.c.bf16 %v386_v13, %v385_v17 }
 0x231   :  { %v2191_v18 = vpack.c.bf16 %v384_v16, %v383_v14  ;;  %1768 = vmatpush3.bf16.msra.mxu0 %v1889_v11 }
 0x233   :  { %1745 = vmatprep.mubr.msk.bf16.mxu0 %vm293_vm9, %v2191_v18 }
 0x234   :  { %1746 = vmatmul.mubr.msk.bf16.gmra.mxu0 %vm293_vm9, %v2193_v19 }
 0x2ec   :  { %v1743_v21 = vpop.f32.mrf.mxu0 }
 0x2ee   :  { %v454_v22 = vpop.f32.mrf.mxu0 }
 0x2f0   :  { %v1744_v23 = vpop.f32.mrf.mxu0 }
 0x2f1   :  { %v486_v24 = vpack.c.bf16 %v1744_v23, %v1743_v21 }
 0x2f2   :  { %v457_v25 = vpop.f32.mrf.mxu0 }
 0x2f3   :  { %v485_v26 = vpack.c.bf16 %v457_v25, %v454_v22  ;;  %501 = vrot.lane.b32.xlu0 %v486_v24, %s1960_s19 }
 0x2f4   :  { %v1747_v14 = vpop.f32.mrf.mxu0 }
 0x2f5   :  { %499 = vrot.lane.b32.xlu1 %v485_v26, %s1960_s19 }
 0x2f6   :  { %v470_v16 = vpop.f32.mrf.mxu0 }
 0x2f7   :  { %562 = vrot.lane.b32.xlu0 %v486_v24, %s1961_s1 }
 0x2f8   :  { %v1748_v17 = vpop.f32.mrf.mxu0 }
 0x2f9   :  { %560 = vrot.lane.b32.xlu1 %v485_v26, %s1961_s1 }
 0x2fb   :  { %660 = vrot.lane.b32.xlu0 %v658_v35, %s1962_s21 }
 0x365   :  { %v502_v27 = vpop.permute.xlu0 %501 }
 0x366   :  { %1749 = vmatprep.subr.bf16.mxu1 %v502_v27 }
 0x367   :  { %1750 = vmatpush3.bf16.msra.mxu1 %v502_v27  ;;  %v500_v28 = vpop.permute.xlu1 %499 }
 0x368   :  { %1751 = vmatprep.subr.bf16.mxu1 %v500_v28 }
 0x369   :  { %v563_v30 = vpop.permute.xlu0 %562 }
 0x36b   :  { %1752 = vmatpush3.bf16.msra.mxu1 %v500_v28  ;;  %v561_v31 = vpop.permute.xlu1 %560 }
 0x36c   :  { %1757 = vmatprep.subr.bf16.mxu1 %v563_v30 }
 0x36d   :  { %v661_v27 = vpop.permute.xlu0 %660 }
 0x36e   :  { %1754 = vmatmul.mubr.msk.bf16.vlgmr.msra.gmra.mxu1 %vm293_vm9, %v2210_v29 }
 0x36f   :  { %1758 = vmatpush3.bf16.msra.mxu1 %v563_v30  ;;  %1761 = vmatprep.mubr.msk.bf16.mxu1 %vm293_vm9, %v2117_v38 }
 0x370   :  { %1759 = vmatprep.subr.bf16.mxu1 %v561_v31 }
 0x373   :  { %1760 = vmatpush3.bf16.msra.mxu1 %v561_v31 }
 0x376   :  { %1762 = vmatmul.mubr.msk.bf16.vlgmr.msra.gmra.mxu1 %vm293_vm9, %v2125_v39 }
 0x377   :  { %1781 = vmatprep.mubr.msk.bf16.mxu1 %vm293_vm9, %v1886_v20  ;;  %v473_v20 = vpop.f32.mrf.mxu0 }
 0x42e   :  { %v1755_v40 = vpop.f32.mrf.mxu1 }
 0x42f   :  { %v617_v41 = vadd.f32 %v1755_v40, %v1743_v21 }
 0x430   :  { %v545_v43 = vpop.f32.mrf.mxu1 }
 0x431   :  { %v615_v44 = vadd.f32 %v545_v43, %v454_v22  ;;  %v625_v49 = vadd.f32 %v622_v42, %v617_v41 }
 0x432   :  { %v1756_v45 = vpop.f32.mrf.mxu1 }
 0x433   :  { %v623_v46 = vadd.f32 %v622_v42, %v615_v44  ;;  %v618_v47 = vadd.f32 %v1756_v45, %v1744_v23  ;;  %v629_v60 = vmax.f32 %v625_v49, 0.0 }
 0x434   :  { %v548_v50 = vpop.f32.mrf.mxu1 }
 0x435   :  { %v626_v53 = vadd.f32 %v622_v42, %v618_v47  ;;  %v616_v55 = vadd.f32 %v548_v50, %v457_v25  ;;  %v627_v57 = vmax.f32 %v623_v46, 0.0  ;;  %v633_v6 = vmul.f32 %v629_v60, %v2153_v54 }
 0x436   :  { %v1763_v56 = vpop.f32.mrf.mxu1 }
 0x437   :  { %v630_v58 = vmax.f32 %v626_v53, 0.0  ;;  %v624_v59 = vadd.f32 %v622_v42, %v616_v55  ;;  %643 = vrot.lane.b32.xlu0 %v1763_v56, %s1962_s21  ;;  %v631_v3 = vmul.f32 %v627_v57, %v2143_v51  ;;  %v1891_v56 = vld [vmem:[%s2465_s11] sm:$0xff]  }
 0x438   :  { %v600_v61 = vpop.f32.mrf.mxu1 }
 0x439   :  { %v628_v62 = vmax.f32 %v624_v59, 0.0  ;;  %v634_v1 = vmul.f32 %v630_v58, %v2138_v48 }
 0x43a   :  { %v1764_v2 = vpop.f32.mrf.mxu1 }
 0x43b   :  { %v632_v5 = vmul.f32 %v628_v62, %v2148_v52  ;;  %639 = vrot.lane.b32.xlu0 %v600_v61, %s1962_s21  ;;  %645 = vrot.lane.b32.xlu1 %v1764_v2, %s1962_s21  ;;  %v713_v13 = vpack.c.bf16 %v634_v1, %v633_v6  ;;  %v1893_v2 = vld [vmem:[%s2464_s10] sm:$0xff]  }
 0x43c   :  { %v603_v9 = vpop.f32.mrf.mxu1 }
 0x43d   :  { %v712_v12 = vpack.c.bf16 %v632_v5, %v631_v3 }
 0x43f   :  { %1769 = vmatprep.mubr.msk.bf16.mxu0 %vm293_vm9, %v712_v12  ;;  %641 = vrot.lane.b32.xlu1 %v603_v9, %s1962_s21 }
 0x440   :  { %1770 = vmatmul.mubr.msk.bf16.vlgmr.msra.gmra.mxu0 %vm293_vm9, %v713_v13 }
 0x4a9   :  { %v644_v28 = vpop.permute.xlu0 %643 }
 0x4ad   :  { %v646_v30 = vpop.permute.xlu1 %645  ;;  %v640_v31 = vpop.permute.xlu0 %639 }
 0x4ae   :  { %v651_v35 = vadd.f32 %v640_v31, %v470_v16  ;;  %v654_v41 = vadd.f32 %v1748_v17, %v646_v30  ;;  %v711_v16 = vld [vmem:[%s2463_s9] sm:$0x3] }
 0x4b0   :  { %v663_v40 = vadd.f32 %v661_v27, %v651_v35  ;;  %v666_v46 = vadd.f32 %v661_v27, %v654_v41 }
 0x4b1   :  { %v642_v34 = vpop.permute.xlu1 %641 }
 0x4b2   :  { %v667_v45 = vmax.f32 %v663_v40, 0.0  ;;  %v670_v58 = vmax.f32 %v666_v46, 0.0 }
 0x500   :  { %v2248_v21 = vpop.f32.mrf.mxu0 }
 0x502   :  { %v2250_v22 = vpop.f32.mrf.mxu0 }
 0x504   :  { %v2252_v23 = vpop.f32.mrf.mxu0 }
 0x505   :  { %v806_v24 = vpack.c.bf16 %v2252_v23, %v2248_v21 }
 0x506   :  { %v2256_v25 = vpop.f32.mrf.mxu0 }
 0x507   :  { %811 = vrot.lane.b32.xlu0 %v806_v24, %s1960_s19  ;;  %866 = vrot.lane.b32.xlu1 %v806_v24, %s1961_s1  ;;  %v805_v26 = vpack.c.bf16 %v2256_v25, %v2250_v22  ;;  %v926_v24 = vrot.slane %v711_v16, %v621_v37 }
 0x50b   :  { %675 = vrot.lane.b32.xlu0 %v2173_v7, %s1962_s21  ;;  %809 = vrot.lane.b32.xlu1 %v805_v26, %s1960_s19  ;;  %v652_v7 = vadd.f32 %v642_v34, %v473_v20  ;;  %s1964_s19 = smov [#allocation2]  }
 0x50f   :  { %679 = vrot.lane.b32.xlu0 %v2185_v10, %s1962_s21  ;;  %677 = vrot.lane.b32.xlu1 %v2178_v8, %s1962_s21  ;;  %v653_v10 = vadd.f32 %v1747_v14, %v644_v28  ;;  %v664_v8 = vadd.f32 %v661_v27, %v652_v7 }
 0x511   :  { %v665_v44 = vadd.f32 %v661_v27, %v653_v10  ;;  %v668_v47 = vmax.f32 %v664_v8, 0.0 }
 0x513   :  { %864 = vrot.lane.b32.xlu0 %v805_v26, %s1961_s1  ;;  %681 = vrot.lane.b32.xlu1 %v2166_v4, %s1962_s21  ;;  %v1890_v4 = vld [vmem:[%s2465_s11 + $0x8] sm:$0xff]   ;;  %v669_v57 = vmax.f32 %v665_v44, 0.0  ;;  %s1543_s1 = sshll.u32 %s1964_s19, 4  ;;  %s1544_s1 = int_to_ptr.vmem [resolvable:$true] %s1543_s1 }
 0x514   :  { %1793 = vmatprep.subr.bf16.mxu0 %v1890_v4  ;;  %p1941_p1 = scmp.lt.s32.totalorder %s1544_s1, %s1544_s1 }
 0x515   :  { %1794 = vmatpush3.bf16.msra.mxu0 %v1890_v4 }
 0x516   :  { %1795 = vmatprep.subr.bf16.mxu0 %v1891_v56 }
 0x519   :  { %1796 = vmatpush3.bf16.msra.mxu0 %v1891_v56 }
 0x51a   :  { %1817 = vmatprep.subr.bf16.mxu0 %v1959_v15 }
 0x579   :  { %v812_v36 = vpop.permute.xlu0 %811  ;;  %v867_v11 = vpop.permute.xlu1 %866 }
 0x57a   :  { %1777 = vmatprep.subr.bf16.mxu1 %v812_v36 }
 0x57b   :  { %1778 = vmatpush3.bf16.msra.mxu1 %v812_v36 }
 0x57d   :  { %v2272_v42 = vpop.permute.xlu0 %675  ;;  %v810_v43 = vpop.permute.xlu1 %809 }
 0x57e   :  { %1779 = vmatprep.subr.bf16.mxu1 %v810_v43  ;;  %v687_v53 = vmul.f32 %v2272_v42, %v667_v45 }
 0x57f   :  { %1780 = vmatpush3.bf16.msra.mxu1 %v810_v43 }
 0x580   :  { %1785 = vmatprep.subr.bf16.mxu1 %v867_v11 }
 0x581   :  { %v2277_v49 = vpop.permute.xlu0 %679  ;;  %v2279_v50 = vpop.permute.xlu1 %677 }
 0x582   :  { %v688_v55 = vmul.f32 %v2279_v50, %v668_v47  ;;  %1782 = vmatmul.mubr.msk.bf16.vlgmr.msra.gmra.mxu1 %vm293_vm9, %v2210_v29  ;;  %v689_v62 = vmul.f32 %v2277_v49, %v669_v57 }
 0x583   :  { %1786 = vmatpush3.bf16.msra.mxu1 %v867_v11  ;;  %1789 = vmatprep.mubr.msk.bf16.mxu1 %vm293_vm9, %v2117_v38  ;;  %v1892_v38 = vld [vmem:[%s2464_s10 + $0x8] sm:$0xff]  }
 0x584   :  { %v1870_v59 = vpack.i.bf16 %v688_v55, %v687_v53 }
 0x585   :  { %v865_v60 = vpop.permute.xlu0 %864  ;;  %v2290_v61 = vpop.permute.xlu1 %681 }
 0x586   :  { %v690_v29 = vmul.f32 %v2290_v61, %v670_v58  ;;  %1787 = vmatprep.subr.bf16.mxu1 %v865_v60  ;;  %1871 = vrot.lane.b32.xlu1 %v1870_v59, %s1962_s21 }
 0x587   :  { %1788 = vmatpush3.bf16.msra.mxu1 %v865_v60 }
 0x588   :  { %v1875_v1 = vpack.i.bf16 %v690_v29, %v689_v62  ;;  %1805 = vmatprep.subr.bf16.mxu1 %v1892_v38 }
 0x58a   :  { %1790 = vmatmul.mubr.msk.bf16.vlgmr.msra.gmra.mxu1 %vm293_vm9, %v2125_v39  ;;  %1876 = vrot.lane.b32.xlu0 %v1875_v1, %s1962_s21 }
 0x58b   :  { %1806 = vmatpush3.bf16.msra.mxu1 %v1892_v38 }
 0x58c   :  { %1807 = vmatprep.subr.bf16.mxu1 %v1893_v2 }
 0x58f   :  { %1808 = vmatpush3.bf16.msra.mxu1 %v1893_v2 }
 0x590   :  { %1829 = vmatprep.subr.bf16.mxu1 %v1959_v15 }
 0x5f8   :  { %v1872_v3 = vpop.permute.xlu1 %1871 }
 0x5f9   :  { %v1874_v5 = vunpack.i.h.bf16 %v1872_v3  ;;  %v1873_v6 = vunpack.i.l.bf16 %v1872_v3 }
 0x5fb   :  { %v714_v39 = vpack.c.bf16 %v1874_v5, %v1873_v6 }
 0x5fc   :  { %v1877_v9 = vpop.permute.xlu0 %1876 }
 0x5fd   :  { %v1879_v12 = vunpack.i.h.bf16 %v1877_v9  ;;  %v1878_v13 = vunpack.i.l.bf16 %v1877_v9  ;;  %1773 = vmatprep.mubr.msk.bf16.mxu0 %vm293_vm9, %v714_v39 }
 0x5ff   :  { %v715_v14 = vpack.c.bf16 %v1879_v12, %v1878_v13 }
 0x601   :  { %1774 = vmatmul.mubr.msk.bf16.gmra.mxu0 %vm293_vm9, %v715_v14 }
 0x602   :  { %1797 = vmatprep.mubr.msk.bf16.mxu0 %vm293_vm9, %v2159_v63 }
 0x609   :  { %1798 = vmatmul.mubr.msk.bf16.vlgmr.msra.gmra.mxu0 %vm293_vm9, %v2161_v0 }
 0x60a   :  { %1801 = vmatprep.mubr.msk.bf16.mxu0 %vm293_vm9, %v2191_v18 }
 0x611   :  { %1802 = vmatmul.mubr.msk.bf16.gmra.mxu0 %vm293_vm9, %v2193_v19 }
 0x612   :  { %1825 = vmatprep.mubr.msk.bf16.mxu0 %vm1963_vm10, %v1959_v15 }
 0x642   :  { %v1783_v17 = vpop.f32.mrf.mxu1 }
 0x643   :  { %v921_v20 = vadd.f32 %v1783_v17, %v2248_v21 }
 0x644   :  { %v849_v63 = vpop.f32.mrf.mxu1 }
 0x645   :  { %v919_v26 = vadd.f32 %v849_v63, %v2250_v22  ;;  %v929_v28 = vadd.f32 %v926_v24, %v921_v20 }
 0x646   :  { %v1784_v0 = vpop.f32.mrf.mxu1 }
 0x647   :  { %v927_v27 = vadd.f32 %v926_v24, %v919_v26  ;;  %v922_v18 = vadd.f32 %v1784_v0, %v2252_v23  ;;  %v933_v21 = vmax.f32 %v929_v28, 0.0 }
 0x648   :  { %v852_v30 = vpop.f32.mrf.mxu1 }
 0x649   :  { %v930_v19 = vadd.f32 %v926_v24, %v922_v18  ;;  %v920_v31 = vadd.f32 %v852_v30, %v2256_v25  ;;  %v931_v35 = vmax.f32 %v927_v27, 0.0  ;;  %v962_v25 = vrot.slane %v711_v16, %v657_v33 }
 0x64a   :  { %v1791_v34 = vpop.f32.mrf.mxu1  ;;  %v2339_v41 = vmul.f32 %v933_v21, %v2153_v54 }
 0x64b   :  { %v934_v7 = vmax.f32 %v930_v19, 0.0  ;;  %v928_v36 = vadd.f32 %v926_v24, %v920_v31  ;;  %947 = vrot.lane.b32.xlu1 %v1791_v34, %s1962_s21  ;;  %v2330_v23 = vmul.f32 %v931_v35, %v2143_v51  ;;  %v1609_v19 = vld [vmem:[%s2466_s12] ss:$0 sm:$0xff] }
 0x64c   :  { %v904_v37 = vpop.f32.mrf.mxu1 }
 0x64d   :  { %v932_v11 = vmax.f32 %v928_v36, 0.0  ;;  %v2327_v22 = vmul.f32 %v934_v7, %v2138_v48 }
 0x64e   :  { %v1792_v10 = vpop.f32.mrf.mxu1 }
 0x64f   :  { %v2333_v40 = vmul.f32 %v932_v11, %v2148_v52  ;;  %943 = vrot.lane.b32.xlu1 %v904_v37, %s1962_s21  ;;  %v996_v51 = vpack.c.bf16 %v2327_v22, %v2339_v41 }
 0x650   :  { %v907_v8 = vpop.f32.mrf.mxu1 }
 0x651   :  { %v995_v48 = vpack.c.bf16 %v2333_v40, %v2330_v23  ;;  %945 = vrot.lane.b32.xlu0 %v907_v8, %s1962_s21 }
 0x653   :  { %1809 = vmatprep.mubr.msk.bf16.mxu1 %vm293_vm9, %v995_v48  ;;  %964 = vrot.lane.b32.xlu1 %v962_v25, %s1962_s21 }
 0x654   :  { %1810 = vmatmul.mubr.msk.bf16.vlgmr.msra.gmra.mxu1 %vm293_vm9, %v996_v51 }
 0x655   :  { %949 = vrot.lane.b32.xlu0 %v1792_v10, %s1962_s21 }
 0x6bd   :  { %v948_v52 = vpop.permute.xlu1 %947 }
 0x6c1   :  { %v944_v54 = vpop.permute.xlu1 %943  ;;  %v1775_v32 = vpop.f32.mrf.mxu0 }
 0x6c2   :  { %v957_v4 = vadd.f32 %v1775_v32, %v948_v52 }
 0x6c3   :  { %v946_v33 = vpop.permute.xlu0 %945  ;;  %v790_v43 = vpop.f32.mrf.mxu0 }
 0x6c4   :  { %v955_v44 = vadd.f32 %v944_v54, %v790_v43 }
 0x6c5   :  { %v965_v45 = vpop.permute.xlu1 %964  ;;  %v1776_v46 = vpop.f32.mrf.mxu0 }
 0x6c6   :  { %v967_v47 = vadd.f32 %v965_v45, %v955_v44  ;;  %v969_v53 = vadd.f32 %v965_v45, %v957_v4 }
 0x6c7   :  { %v950_v55 = vpop.permute.xlu0 %949  ;;  %v793_v56 = vpop.f32.mrf.mxu0 }
 0x6c8   :  { %v958_v57 = vadd.f32 %v1776_v46, %v950_v55  ;;  %v956_v58 = vadd.f32 %v946_v33, %v793_v56  ;;  %v971_v59 = vmax.f32 %v967_v47, 0.0  ;;  %v973_v1 = vmax.f32 %v969_v53, 0.0 }
 0x6c9   :  { %v1799_v13 = vpop.f32.mrf.mxu0 }
 0x6ca   :  { %v970_v60 = vadd.f32 %v965_v45, %v958_v57  ;;  %v968_v62 = vadd.f32 %v965_v45, %v956_v58  ;;  %v975_v29 = vmul.f32 %v971_v59, %v2272_v42  ;;  %v977_v3 = vmul.f32 %v973_v1, %v2277_v49 }
 0x6cb   :  { %v1053_v14 = vpop.f32.mrf.mxu0 }
 0x6cc   :  { %v972_v38 = vmax.f32 %v968_v62, 0.0  ;;  %983 = vrot.lane.b32.xlu0 %v975_v29, %s1962_s21  ;;  %v974_v2 = vmax.f32 %v970_v60, 0.0 }
 0x6cd   :  { %v1800_v16 = vpop.f32.mrf.mxu0 }
 0x6ce   :  { %v976_v5 = vmul.f32 %v972_v38, %v2279_v50  ;;  %v978_v6 = vmul.f32 %v974_v2, %v2290_v61  ;;  %v1894_v61 = vld [vmem:[%s2467_s13 + $0x8] sm:$0xff]  }
 0x6cf   :  { %1830 = vmatpush3.bf16.msra.mxu1 %v1894_v61  ;;  %v1056_v20 = vpop.f32.mrf.mxu0 }
 0x6d0   :  { %987 = vrot.lane.b32.xlu0 %v977_v3, %s1962_s21  ;;  %985 = vrot.lane.b32.xlu1 %v976_v5, %s1962_s21 }
 0x6d1   :  { %1831 = vmatprep.subr.bf16.mxu1 %v1959_v15  ;;  %v1803_v63 = vpop.f32.mrf.mxu0 }
 0x6d3   :  { %v1069_v0 = vpop.f32.mrf.mxu0 }
 0x6d4   :  { %989 = vrot.lane.b32.xlu1 %v978_v6, %s1962_s21 }
 0x6d5   :  { %v1804_v34 = vpop.f32.mrf.mxu0 }
 0x6d7   :  { %v1072_v52 = vpop.f32.mrf.mxu0 }
 0x714   :  { %v1811_v17 = vpop.f32.mrf.mxu1 }
 0x715   :  { %v1151_v28 = vadd.f32 %v1811_v17, %v1799_v13 }
 0x716   :  { %v1142_v24 = vpop.f32.mrf.mxu1 }
 0x717   :  { %v1182_v11 = vadd.f32 %v1609_v19, %v1151_v28  ;;  %v1143_v25 = vadd.f32 %v1142_v24, %v1053_v14 }
 0x718   :  { %v1812_v26 = vpop.f32.mrf.mxu1 }
 0x719   :  { %v1154_v27 = vadd.f32 %v1812_v26, %v1800_v16  ;;  %v1612_v45 = vmul.f32 -1.442695, %v1182_v11  ;;  %v1180_v46 = vadd.f32 %v1609_v19, %v1143_v25 }
 0x71a   :  { %v1145_v18 = vpop.f32.mrf.mxu1 }
 0x71b   :  { %v1183_v35 = vadd.f32 %v1609_v19, %v1154_v27  ;;  %v1146_v7 = vadd.f32 %v1145_v18, %v1056_v20  ;;  %v1610_v57 = vmul.f32 -1.442695, %v1180_v46 }
 0x71d   :  { %v1613_v54 = vmul.f32 -1.442695, %v1183_v35  ;;  %v1181_v32 = vadd.f32 %v1609_v19, %v1146_v7 }
 0x71f   :  { %v1611_v55 = vmul.f32 -1.442695, %v1181_v32  ;;  %v1903_v32 = vld [vmem:[%s2470_s16] sm:$0xff]  }
 0x73e   :  { %v2358_v39 = vpop.permute.xlu0 %983 }
 0x742   :  { %v2360_v42 = vpop.permute.xlu1 %985  ;;  %v2365_v49 = vpop.permute.xlu0 %987 }
 0x743   :  { %v997_v9 = vpack.c.bf16 %v2360_v42, %v2358_v39 }
 0x745   :  { %1813 = vmatprep.mubr.msk.bf16.mxu1 %vm293_vm9, %v997_v9 }
 0x746   :  { %v2367_v50 = vpop.permute.xlu1 %989 }
 0x747   :  { %v998_v12 = vpack.c.bf16 %v2367_v50, %v2365_v49 }
 0x749   :  { %1814 = vmatmul.mubr.msk.bf16.gmra.mxu1 %vm293_vm9, %v998_v12 }
 0x74a   :  { %1833 = vmatprep.mubr.msk.bf16.mxu1 %vm1963_vm10, %v1959_v15 }
 0x809   :  { %v1815_v30 = vpop.f32.mrf.mxu1 }
 0x80a   :  { %v1167_v31 = vadd.f32 %v1815_v30, %v1803_v63 }
 0x80b   :  { %v1158_v36 = vpop.f32.mrf.mxu1 }
 0x80c   :  { %v1186_v21 = vadd.f32 %v1609_v19, %v1167_v31  ;;  %v1159_v37 = vadd.f32 %v1158_v36, %v1069_v0  ;;  %v1896_v36 = vld [vmem:[%s2469_s15 + $0x18] sm:$0xff]  }
 0x80d   :  { %v1816_v10 = vpop.f32.mrf.mxu1 }
 0x80e   :  { %v1616_v8 = vmul.f32 -1.442695, %v1186_v21  ;;  %v1184_v48 = vadd.f32 %v1609_v19, %v1159_v37  ;;  %v1170_v51 = vadd.f32 %v1816_v10, %v1804_v34  ;;  %v1897_v10 = vld [vmem:[%s2469_s15 + $0x10] sm:$0xff]  }
 0x80f   :  { %v1161_v33 = vpop.f32.mrf.mxu1 }
 0x810   :  { %1904 = vpow2.f32 %v1616_v8  ;;  %v1614_v43 = vmul.f32 -1.442695, %v1184_v48  ;;  %v1187_v4 = vadd.f32 %v1609_v19, %v1170_v51  ;;  %v1162_v44 = vadd.f32 %v1161_v33, %v1072_v52  ;;  %v1898_v8 = vld [vmem:[%s2469_s15 + $0x8] sm:$0xff]   ;;  %v1899_v48 = vld [vmem:[%s2469_s15] sm:$0xff]   ;;  %v1900_v51 = vld [vmem:[%s2470_s16 + $0x18] sm:$0xff]  }
 0x811   :  { %v1901_v52 = vld [vmem:[%s2470_s16 + $0x10] sm:$0xff]  }
 0x812   :  { %1906 = vpow2.f32 %v1614_v43  ;;  %v1617_v47 = vmul.f32 -1.442695, %v1187_v4  ;;  %v1185_v53 = vadd.f32 %v1609_v19, %v1162_v44  ;;  %v1622_v43 = vld [vmem:[%s2468_s14] ss:$0 sm:$0xff] }
 0x813   :  { %1908 = vpow2.f32 %v1613_v54  ;;  %v1902_v54 = vld [vmem:[%s2470_s16 + $0x8] sm:$0xff]  }
 0x814   :  { %1910 = vpow2.f32 %v1617_v47  ;;  %v1615_v56 = vmul.f32 -1.442695, %v1185_v53 }
 0x815   :  { %1912 = vpow2.f32 %v1612_v45 }
 0x816   :  { %1914 = vpow2.f32 %v1615_v56 }
 0x817   :  { %1916 = vpow2.f32 %v1611_v55 }
 0x818   :  { %1918 = vpow2.f32 %v1610_v57 }
 0x81d   :  { %v1905_v58 = vpop.eup %1904 }
 0x81e   :  { %v1218_v59 = vadd.f32 1.0, %v1905_v58 }
 0x81f   :  { %v1907_v60 = vpop.eup %1906 }
 0x820   :  { %v1909_v62 = vpop.eup %1908  ;;  %v1216_v1 = vadd.f32 1.0, %v1907_v60  ;;  %1920 = vrcp.f32 %v1218_v59 }
 0x821   :  { %v1911_v29 = vpop.eup %1910  ;;  %v1215_v5 = vadd.f32 1.0, %v1909_v62 }
 0x822   :  { %v1913_v38 = vpop.eup %1912  ;;  %v1219_v2 = vadd.f32 1.0, %v1911_v29 }
 0x823   :  { %v1915_v3 = vpop.eup %1914  ;;  %v1214_v12 = vadd.f32 1.0, %v1913_v38 }
 0x824   :  { %1922 = vrcp.f32 %v1219_v2  ;;  %v1217_v6 = vadd.f32 1.0, %v1915_v3  ;;  %v1917_v9 = vpop.eup %1916  ;;  %v1634_v2 = vld [vmem:[%s2471_s17] ss:$0 sm:$0xff] }
 0x825   :  { %1924 = vrcp.f32 %v1216_v1  ;;  %v1919_v61 = vpop.eup %1918  ;;  %v1213_v13 = vadd.f32 1.0, %v1917_v9 }
 0x826   :  { %1926 = vrcp.f32 %v1217_v6  ;;  %v1212_v14 = vadd.f32 1.0, %v1919_v61 }
 0x827   :  { %1928 = vrcp.f32 %v1215_v5 }
 0x828   :  { %1930 = vrcp.f32 %v1214_v12 }
 0x829   :  { %1932 = vrcp.f32 %v1213_v13 }
 0x82a   :  { %1934 = vrcp.f32 %v1212_v14 }
 0x82d   :  { %v1921_v16 = vpop.eup %1920 }
 0x82e   :  { %v1242_v24 = vmul.f32 %v1921_v16, %v2365_v49 }
 0x831   :  { %v1923_v17 = vpop.eup %1922 }
 0x832   :  { %v1925_v20 = vpop.eup %1924  ;;  %v1243_v63 = vmul.f32 %v1923_v17, %v2367_v50 }
 0x833   :  { %v1927_v26 = vpop.eup %1926  ;;  %v1240_v28 = vmul.f32 %v1925_v20, %v2358_v39 }
 0x834   :  { %v1248_v0 = vpack.c.bf16 %v1243_v63, %v1242_v24  ;;  %v1241_v27 = vmul.f32 %v1927_v26, %v2360_v42  ;;  %v1929_v18 = vpop.eup %1928 }
 0x835   :  { %v1931_v30 = vpop.eup %1930  ;;  %v1239_v31 = vmul.f32 %v1929_v18, %v2327_v22  ;;  %v1244_v22 = vld [vmem:[%s2458_s4] sm:$0x3] }
 0x836   :  { %1818 = vmatpush3.bf16.msra.mxu0 %v1248_v0  ;;  %v1247_v19 = vpack.c.bf16 %v1241_v27, %v1240_v28  ;;  %v1933_v34 = vpop.eup %1932  ;;  %v1238_v49 = vmul.f32 %v1931_v30, %v2339_v41 }
 0x837   :  { %1819 = vmatprep.subr.bf16.mxu0 %v1959_v15  ;;  %v1935_v35 = vpop.eup %1934  ;;  %v1237_v42 = vmul.f32 %v1933_v34, %v2333_v40  ;;  %v1623_v40 = vld [vmem:[%s2468_s14 + $0x1] ss:$0 sm:$0xff] }
 0x838   :  { %v1246_v50 = vpack.c.bf16 %v1239_v31, %v1238_v49  ;;  %v1236_v7 = vmul.f32 %v1935_v35, %v2330_v23  ;;  %v1895_v23 = vld [vmem:[%s2467_s13] sm:$0xff]   ;;  %1366 = vrot.lane.b32.xlu0 %v1623_v40, %s1962_s21 }
 0x839   :  { %1832 = vmatpush3.bf16.msra.mxu1 %v1895_v23 }
 0x83a   :  { %1820 = vmatpush3.bf16.msra.mxu0 %v1247_v19  ;;  %v1245_v39 = vpack.c.bf16 %v1237_v42, %v1236_v7  ;;  %1849 = vmatprep.subr.bf16.mxu1 %v1959_v15 }
 0x83b   :  { %1821 = vmatprep.subr.bf16.mxu0 %v1959_v15 }
 0x83e   :  { %1822 = vmatpush3.bf16.msra.mxu0 %v1246_v50 }
 0x83f   :  { %1823 = vmatprep.subr.bf16.mxu0 %v1959_v15 }
 0x842   :  { %1824 = vmatpush3.bf16.msra.mxu0 %v1245_v39 }
 0x843   :  { %1837 = vmatprep.subr.bf16.mxu0 %v1959_v15 }
 0x845   :  { %1826 = vmatmul.mubr.msk.bf16.vlgmr.msra.gmra.mxu0 %vm1249_vm11, %v1244_v22 }
 0x846   :  { %1845 = vmatprep.mubr.msk.bf16.mxu0 %vm1963_vm10, %v1959_v15  ;;  %1838 = vmatpush3.bf16.msra.mxu0 %v1900_v51 }
 0x847   :  { %1839 = vmatprep.subr.bf16.mxu0 %v1959_v15 }
 0x84a   :  { %1840 = vmatpush3.bf16.msra.mxu0 %v1901_v52 }
 0x84b   :  { %1841 = vmatprep.subr.bf16.mxu0 %v1959_v15 }
 0x84e   :  { %1842 = vmatpush3.bf16.msra.mxu0 %v1902_v54 }
 0x84f   :  { %1843 = vmatprep.subr.bf16.mxu0 %v1959_v15 }
 0x852   :  { %1844 = vmatpush3.bf16.msra.mxu0 %v1903_v32 }
 0x8aa   :  { %v1367_v33 = vpop.permute.xlu0 %1366 }
 0x905   :  { %v1287_v41 = vpop.f32.mrf.mxu0 }
 0x906   :  { %v1293_v21 = vpack.c.bf16 %v1287_v41, %v1287_v41 }
 0x907   :  { %v1827_v37 = vpop.f32.mrf.mxu0 }
 0x908   :  { %1834 = vmatmul.mubr.msk.bf16.vlgmr.msra.gmra.mxu1 %vm293_vm9, %v1293_v21 }
 0x909   :  { %v1290_v11 = vpop.f32.mrf.mxu0  ;;  %1850 = vmatpush3.bf16.msra.mxu1 %v1896_v36  ;;  %1857 = vmatprep.mubr.msk.bf16.mxu1 %vm1963_vm10, %v1959_v15 }
 0x90a   :  { %1851 = vmatprep.subr.bf16.mxu1 %v1959_v15 }
 0x90b   :  { %v1828_v25 = vpop.f32.mrf.mxu0 }
 0x90d   :  { %1852 = vmatpush3.bf16.msra.mxu1 %v1897_v10 }
 0x90e   :  { %1853 = vmatprep.subr.bf16.mxu1 %v1959_v15 }
 0x911   :  { %1854 = vmatpush3.bf16.msra.mxu1 %v1898_v8 }
 0x912   :  { %1855 = vmatprep.subr.bf16.mxu1 %v1959_v15 }
 0x915   :  { %1856 = vmatpush3.bf16.msra.mxu1 %v1899_v48 }
 0x9c8   :  { %v1347_v4 = vpop.f32.mrf.mxu1 }
 0x9c9   :  { %v1358_v44 = vadd.f32 %v1622_v43, %v1347_v4  ;;  %v1369_v45 = vadd.f32 %v1367_v33, %v1347_v4 }
 0x9ca   :  { %v1835_v46 = vpop.f32.mrf.mxu1 }
 0x9cb   :  { %v1359_v47 = vmax.f32 %v1358_v44, 0.0  ;;  %v1370_v53 = vmax.f32 %v1369_v45, 0.0 }
 0x9cc   :  { %v1350_v55 = vpop.f32.mrf.mxu1 }
 0x9cd   :  { %v1371_v56 = vpack.c.bf16 %v1359_v47, %v1359_v47  ;;  %v1380_v57 = vpack.c.bf16 %v1370_v53, %v1370_v53 }
 0x9ce   :  { %v1836_v58 = vpop.f32.mrf.mxu1 }
 0x9cf   :  { %v1390_v59 = vrot.slane %v1380_v57, 1  ;;  %1858 = vmatmul.mubr.msk.bf16.vlgmr.msra.gmra.mxu1 %vm1249_vm11, %v1371_v56 }
 0x9d1   :  { %1391 = vrot.lane.b32.xlu1 %v1390_v59, %s1962_s21  ;;  %s1936_s21 = scalar_lea.vmem %s1544_s1, 32 }
 0x9d2   :  { %p1937_p0 = scmp.ne.s32.totalorder %s1544_s1, %s1936_s21  ;;  %p1942_p2 = scmp.lt.s32.totalorder %s1936_s21, %s1936_s21 }
 0x9d4   :  { %p1943_p3 = por %p1942_p2, %p1941_p1 }
 0x9d6   :  { %p1944_p4 = pnand %p1943_p3, %p1937_p0 }
 0xa43   :  { %v1392_v15 = vpop.permute.xlu1 %1391 }
 0xa44   :  { %1846 = vmatmul.mubr.msk.bf16.vlgmr.msra.gmra.mxu0 %vm1249_vm11, %v1392_v15 }
 0xa8f   :  { %v1521_v60 = vpop.f32.mrf.mxu1 }
 0xa91   :  { %v1859_v62 = vpop.f32.mrf.mxu1 }
 0xa93   :  { %v1524_v29 = vpop.f32.mrf.mxu1 }
 0xa95   :  { %v1860_v1 = vpop.f32.mrf.mxu1 }
 0xb04   :  { %v1454_v38 = vpop.f32.mrf.mxu0 }
 0xb05   :  { %v1522_v3 = vadd.f32 %v1521_v60, %v1454_v38 }
 0xb06   :  { %v1847_v5 = vpop.f32.mrf.mxu0 }
 0xb07   :  { %v1534_v6 = vadd.f32 %v1634_v2, %v1522_v3 }
 0xb08   :  { %v1457_v9 = vpop.f32.mrf.mxu0 }
 0xb09   :  { %1536 = vst.msk [vmem:[#allocation2] sm:$0x3] %vm1535_vm12, %v1534_v6 }
 0xb0a   :  { %v1848_v12 = vpop.f32.mrf.mxu0 }
 0xb0b   :  { %1947 = shalt.err (!%p1944_p4)
}
 0xb0c   :  { %1546 = dma.vmem_to_hbm [thread:$0]  %s1544_s1, 32, %s2472_s18, [#allocation3]  }
 0xb0d   :  { %1956 = dma.done.wait [#allocation3], 32  }
 0xb0e   :  { %1957 = vsyncadd [#allocation3], 4294967264 }
 0xb0f   :  { %1550 = vsyncpa [#allocation3], 1 }

</bundles_post_ra>
